<compile_context>
chip_gen: v5e
topology: v5e:2x2
jax: 0.10.0
libtpu: 0.0.40
codegen_flags: <defaults>
</compile_context>

<pallas_src>
import jax
import jax.numpy as jnp
from jax.experimental import pallas as pl
from jax.experimental.pallas import tpu as pltpu


def _elu(x):
    # nn.ELU(alpha=1.0). exp(x)-1 in the epilogue dtype; the unselected branch
    # (exp of large positive x) is discarded by the select, so no clamp needed.
    one = jnp.asarray(1.0, dtype=x.dtype)
    return jnp.where(x > 0, x, jnp.exp(x) - one)


def _make_mlp_kernel(epi_dtype):
    """epi_dtype: dtype for the bias-add + ELU epilogue (bf16 on v6e/v7x)."""

    def kernel(obs_ref, mean_ref, w1_ref, b1_ref, w2_ref, b2_ref, w3_ref,
               b3_ref, out_ref):
        # obs: (TB, Din) f32; mean: (1, Din) f32; w*: (in, out) bf16.
        # 1/std is pre-folded into w1's columns; subtract mean in f32 first.
        x = (obs_ref[...] - mean_ref[...]).astype(jnp.bfloat16)
        h = jnp.dot(x, w1_ref[...], preferred_element_type=jnp.float32)
        h = _elu(h.astype(epi_dtype) + b1_ref[...])
        h = jnp.dot(h.astype(jnp.bfloat16), w2_ref[...],
                    preferred_element_type=jnp.float32)
        h = _elu(h.astype(epi_dtype) + b2_ref[...])
        out = jnp.dot(h.astype(jnp.bfloat16), w3_ref[...],
                      preferred_element_type=jnp.float32)
        out_ref[...] = (out + b3_ref[...]).astype(out_ref.dtype)

    return kernel


def _round_up(x, m):
    return (x + m - 1) // m * m


def _device_kind():
    try:
        return jax.devices()[0].device_kind.lower()
    except Exception:
        return ""


def _epilogue_dtype():
    # bf16 VPU/EUP paths exist on v6e / v7x; keep f32 epilogue elsewhere.
    kind = _device_kind()
    if any(tag in kind for tag in ("v6", "v7", "7x")):
        return jnp.bfloat16
    return jnp.float32


def _num_tensorcores():
    # Chips whose "device" spans two TensorCores (megacore): v4, v5p, v7x.
    kind = _device_kind()
    if any(tag in kind for tag in ("v4", "v5p", "v7", "7x")):
        return 2
    return 1


def _choose_batch_tile(batch, num_cores):
    """Batch-tile rows (multiple of 8, or the full batch dim)."""
    if num_cores >= 2 and batch > 128:
        # >=2 grid steps so the "parallel" batch axis shards across both TCs,
        # capped at 512 rows so per-step overhead stays amortized.
        return min(512, _round_up(pl.cdiv(batch, 2), 8))
    # Single-TensorCore chips (or tiny batch): fewest, biggest steps.
    if batch <= 1024:
        return batch                    # single grid step; block == full dim
    return 512


@jax.jit
def low_level_network_forward(obs, mean, std, w1, b1, w2, b2, w3, b3):
    """obs: (B, obs_size) f32. Weights in torch nn.Linear convention (out, in)."""
    B, Din = obs.shape
    H1 = w1.shape[0]
    H2 = w2.shape[0]
    A = w3.shape[0]

    epi_dtype = _epilogue_dtype()

    # Fold only the 1/std scale into W1 (column-scale). Mean handled in-kernel.
    inv_std = (1.0 / std).astype(jnp.float32)
    w1t = (w1 * inv_std[None, :]).T.astype(jnp.bfloat16)   # (Din, H1)
    w2t = w2.T.astype(jnp.bfloat16)                        # (H1, H2)
    w3t = w3.T.astype(jnp.bfloat16)                        # (H2, A)
    mean_r = mean.reshape(1, Din).astype(jnp.float32)
    b1r = b1.reshape(1, H1).astype(epi_dtype)
    b2r = b2.reshape(1, H2).astype(epi_dtype)
    b3r = b3.reshape(1, A).astype(jnp.float32)

    tile_b = _choose_batch_tile(B, _num_tensorcores())
    grid = (pl.cdiv(B, tile_b),)        # ragged last tile: OOB writes masked

    inv = lambda shape: pl.BlockSpec(shape, lambda i: (0, 0))  # grid-invariant

    cost = pl.CostEstimate(
        flops=2 * B * (Din * H1 + H1 * H2 + H2 * A),
        transcendentals=B * (H1 + H2),
        bytes_accessed=(B * Din * 4 + B * A * 4
                        + (Din * H1 + H1 * H2 + H2 * A) * 2
                        + (Din + H1 + H2 + A) * 4),
    )

    return pl.pallas_call(
        _make_mlp_kernel(epi_dtype),
        out_shape=jax.ShapeDtypeStruct((B, A), jnp.float32),
        grid_spec=pltpu.PrefetchScalarGridSpec(
            num_scalar_prefetch=0,
            grid=grid,
            in_specs=[
                pl.BlockSpec((tile_b, Din), lambda i: (i, 0)),  # obs batch tile
                inv((1, Din)),                                  # mean
                inv((Din, H1)), inv((1, H1)),                   # W1/std, b1
                inv((H1, H2)), inv((1, H2)),                    # W2, b2
                inv((H2, A)), inv((1, A)),                      # W3, b3
            ],
            out_specs=pl.BlockSpec((tile_b, A), lambda i: (i, 0)),
        ),
        compiler_params=pltpu.CompilerParams(
            dimension_semantics=("parallel",)),
        cost_estimate=cost,
    )(obs, mean_r, w1t, b1r, w2t, b2r, w3t, b3r)


def _reference_forward(obs, mean, std, w1, b1, w2, b2, w3, b3):
    def elu(x):
        return jnp.where(x > 0, x, jnp.expm1(x))
    x = (obs - mean) / std
    h = elu(x @ w1.T + b1)
    h = elu(h @ w2.T + b2)
    return h @ w3.T + b3


if __name__ == "__main__":
    # obs_size = 3 + 6 + 3 + 3 + 12 + 12 + 12 + 4 + 12 = 67 proprioceptive dims.
    # nn_size shrunk to 64 for the example (256 in the real module), action=12.
    obs_size, nn_size, action_size = 67, 64, 12

    key = jax.random.PRNGKey(0)
    ks = jax.random.split(key, 10)

    mean = jax.random.normal(ks[1], (obs_size,), jnp.float32) * 0.1
    # running_var ** 0.5 + 1e-5, so std > 0
    std = jnp.abs(jax.random.normal(ks[2], (obs_size,), jnp.float32)) * 0.5 + 0.5
    w1 = jax.random.normal(ks[3], (nn_size, obs_size), jnp.float32) * 0.1
    b1 = jax.random.normal(ks[4], (nn_size,), jnp.float32) * 0.1
    w2 = jax.random.normal(ks[5], (nn_size, nn_size), jnp.float32) * 0.1
    b2 = jax.random.normal(ks[6], (nn_size,), jnp.float32) * 0.1
    w3 = jax.random.normal(ks[7], (action_size, nn_size), jnp.float32) * 0.1
    b3 = jax.random.normal(ks[8], (action_size,), jnp.float32) * 0.1

    # Exercise: single-step small batch, the >=2-step (possibly ragged) path,
    # and the 512-row large-batch tile path.
    for batch in (4, 200, 1500):
        obs = jax.random.normal(ks[0], (batch, obs_size), jnp.float32)
        out = jax.block_until_ready(
            low_level_network_forward(obs, mean, std, w1, b1, w2, b2, w3, b3))
        ref = _reference_forward(obs, mean, std, w1, b1, w2, b2, w3, b3)
        assert out.shape == (batch, action_size), out.shape
        err = float(jnp.max(jnp.abs(out - ref)))
        # bf16 MXU operands (and bf16 epilogue on v6e/v7x) with f32 accumulation.
        assert err < 0.1, (batch, err)

    print("KERNEL_OK")
</pallas_src>

<mosaic_0001>
module attributes {stable_mosaic.version = 11 : i64} {
  func.func @kernel(%arg0: i32, %arg1: memref<4x67xf32, #tpu.memory_space<vmem>>, %arg2: memref<1x67xf32, #tpu.memory_space<vmem>>, %arg3: memref<67x64xbf16, #tpu.memory_space<vmem>>, %arg4: memref<1x64xf32, #tpu.memory_space<vmem>>, %arg5: memref<64x64xbf16, #tpu.memory_space<vmem>>, %arg6: memref<1x64xf32, #tpu.memory_space<vmem>>, %arg7: memref<64x12xbf16, #tpu.memory_space<vmem>>, %arg8: memref<1x12xf32, #tpu.memory_space<vmem>>, %arg9: memref<4x12xf32, #tpu.memory_space<vmem>>) attributes {dimension_semantics = [#tpu.dimension_semantics<parallel>], iteration_bounds = array<i64: 1>, scalar_prefetch = 0 : i64, scratch_operands = 0 : i64, tpu.core_type = #tpu.core_type<tc>, window_params = [{transform_indices = @transform_0, window_bounds = array<i64: 4, 67>}, {pipeline_mode = #tpu.pipeline_mode<synchronous>, transform_indices = @transform_1, window_bounds = array<i64: 1, 67>}, {pipeline_mode = #tpu.pipeline_mode<synchronous>, transform_indices = @transform_2, window_bounds = array<i64: 67, 64>}, {pipeline_mode = #tpu.pipeline_mode<synchronous>, transform_indices = @transform_3, window_bounds = array<i64: 1, 64>}, {pipeline_mode = #tpu.pipeline_mode<synchronous>, transform_indices = @transform_4, window_bounds = array<i64: 64, 64>}, {pipeline_mode = #tpu.pipeline_mode<synchronous>, transform_indices = @transform_5, window_bounds = array<i64: 1, 64>}, {pipeline_mode = #tpu.pipeline_mode<synchronous>, transform_indices = @transform_6, window_bounds = array<i64: 64, 12>}, {pipeline_mode = #tpu.pipeline_mode<synchronous>, transform_indices = @transform_7, window_bounds = array<i64: 1, 12>}, {transform_indices = @transform_8, window_bounds = array<i64: 4, 12>}]} {
    %c0 = arith.constant 0 : index
    %c0_0 = arith.constant 0 : index
    %0 = vector.load %arg1[%c0, %c0_0] : memref<4x67xf32, #tpu.memory_space<vmem>>, vector<4x67xf32>
    %c0_1 = arith.constant 0 : index
    %c0_2 = arith.constant 0 : index
    %1 = vector.load %arg2[%c0_1, %c0_2] : memref<1x67xf32, #tpu.memory_space<vmem>>, vector<1x67xf32>
    %2 = vector.broadcast %1 : vector<1x67xf32> to vector<4x67xf32>
    %3 = arith.subf %0, %2 : vector<4x67xf32>
    %4 = arith.truncf %3 : vector<4x67xf32> to vector<4x67xbf16>
    %c0_3 = arith.constant 0 : index
    %c0_4 = arith.constant 0 : index
    %5 = vector.load %arg3[%c0_3, %c0_4] : memref<67x64xbf16, #tpu.memory_space<vmem>>, vector<67x64xbf16>
    %cst = arith.constant dense<0.000000e+00> : vector<4x64xf32>
    %6 = tpu.matmul %4, %5, %cst {dimension_numbers = #tpu.dot_dimension_numbers<[1], [0], [0], [1], [0, 0, 1, 1], [], []>} : vector<4x67xbf16>, vector<67x64xbf16>, vector<4x64xf32> -> vector<4x64xf32>
    %c0_5 = arith.constant 0 : index
    %c0_6 = arith.constant 0 : index
    %7 = vector.load %arg4[%c0_5, %c0_6] : memref<1x64xf32, #tpu.memory_space<vmem>>, vector<1x64xf32>
    %8 = vector.broadcast %7 : vector<1x64xf32> to vector<4x64xf32>
    %9 = arith.addf %6, %8 : vector<4x64xf32>
    %cst_7 = arith.constant 0.000000e+00 : f32
    %10 = vector.broadcast %cst_7 : f32 to vector<4x64xf32>
    %11 = arith.cmpf ogt, %9, %10 : vector<4x64xf32>
    %12 = math.exp %9 : vector<4x64xf32>
    %cst_8 = arith.constant 1.000000e+00 : f32
    %13 = vector.broadcast %cst_8 : f32 to vector<4x64xf32>
    %14 = arith.subf %12, %13 : vector<4x64xf32>
    %15 = arith.select %11, %9, %14 : vector<4x64xi1>, vector<4x64xf32>
    %16 = arith.truncf %15 : vector<4x64xf32> to vector<4x64xbf16>
    %c0_9 = arith.constant 0 : index
    %c0_10 = arith.constant 0 : index
    %17 = vector.load %arg5[%c0_9, %c0_10] : memref<64x64xbf16, #tpu.memory_space<vmem>>, vector<64x64xbf16>
    %cst_11 = arith.constant dense<0.000000e+00> : vector<4x64xf32>
    %18 = tpu.matmul %16, %17, %cst_11 {dimension_numbers = #tpu.dot_dimension_numbers<[1], [0], [0], [1], [0, 0, 1, 1], [], []>} : vector<4x64xbf16>, vector<64x64xbf16>, vector<4x64xf32> -> vector<4x64xf32>
    %c0_12 = arith.constant 0 : index
    %c0_13 = arith.constant 0 : index
    %19 = vector.load %arg6[%c0_12, %c0_13] : memref<1x64xf32, #tpu.memory_space<vmem>>, vector<1x64xf32>
    %20 = vector.broadcast %19 : vector<1x64xf32> to vector<4x64xf32>
    %21 = arith.addf %18, %20 : vector<4x64xf32>
    %cst_14 = arith.constant 0.000000e+00 : f32
    %22 = vector.broadcast %cst_14 : f32 to vector<4x64xf32>
    %23 = arith.cmpf ogt, %21, %22 : vector<4x64xf32>
    %24 = math.exp %21 : vector<4x64xf32>
    %cst_15 = arith.constant 1.000000e+00 : f32
    %25 = vector.broadcast %cst_15 : f32 to vector<4x64xf32>
    %26 = arith.subf %24, %25 : vector<4x64xf32>
    %27 = arith.select %23, %21, %26 : vector<4x64xi1>, vector<4x64xf32>
    %28 = arith.truncf %27 : vector<4x64xf32> to vector<4x64xbf16>
    %c0_16 = arith.constant 0 : index
    %c0_17 = arith.constant 0 : index
    %29 = vector.load %arg7[%c0_16, %c0_17] : memref<64x12xbf16, #tpu.memory_space<vmem>>, vector<64x12xbf16>
    %cst_18 = arith.constant dense<0.000000e+00> : vector<4x12xf32>
    %30 = tpu.matmul %28, %29, %cst_18 {dimension_numbers = #tpu.dot_dimension_numbers<[1], [0], [0], [1], [0, 0, 1, 1], [], []>} : vector<4x64xbf16>, vector<64x12xbf16>, vector<4x12xf32> -> vector<4x12xf32>
    %c0_19 = arith.constant 0 : index
    %c0_20 = arith.constant 0 : index
    %31 = vector.load %arg8[%c0_19, %c0_20] : memref<1x12xf32, #tpu.memory_space<vmem>>, vector<1x12xf32>
    %32 = vector.broadcast %31 : vector<1x12xf32> to vector<4x12xf32>
    %33 = arith.addf %30, %32 : vector<4x12xf32>
    %c0_21 = arith.constant 0 : index
    %c0_22 = arith.constant 0 : index
    %34 = vector.load %arg9[%c0_21, %c0_22] : memref<4x12xf32, #tpu.memory_space<vmem>>, vector<4x12xf32>
    tpu.vector_store %arg9[%c0_21, %c0_22], %33 {strides = array<i32>} : memref<4x12xf32, #tpu.memory_space<vmem>>, vector<4x12xf32>,
    return
  }
  func.func @transform_0(%arg0: i32) -> (i32, i32) {
    %c0_i32 = arith.constant 0 : i32
    %c0_i32_0 = arith.constant 0 : i32
    return %arg0, %c0_i32 : i32, i32
  }
  func.func @transform_1(%arg0: i32) -> (i32, i32) {
    %c0_i32 = arith.constant 0 : i32
    %c0_i32_0 = arith.constant 0 : i32
    %c0_i32_1 = arith.constant 0 : i32
    return %c0_i32, %c0_i32_0 : i32, i32
  }
  func.func @transform_2(%arg0: i32) -> (i32, i32) {
    %c0_i32 = arith.constant 0 : i32
    %c0_i32_0 = arith.constant 0 : i32
    %c0_i32_1 = arith.constant 0 : i32
    return %c0_i32, %c0_i32_0 : i32, i32
  }
  func.func @transform_3(%arg0: i32) -> (i32, i32) {
    %c0_i32 = arith.constant 0 : i32
    %c0_i32_0 = arith.constant 0 : i32
    %c0_i32_1 = arith.constant 0 : i32
    return %c0_i32, %c0_i32_0 : i32, i32
  }
  func.func @transform_4(%arg0: i32) -> (i32, i32) {
    %c0_i32 = arith.constant 0 : i32
    %c0_i32_0 = arith.constant 0 : i32
    %c0_i32_1 = arith.constant 0 : i32
    return %c0_i32, %c0_i32_0 : i32, i32
  }
  func.func @transform_5(%arg0: i32) -> (i32, i32) {
    %c0_i32 = arith.constant 0 : i32
    %c0_i32_0 = arith.constant 0 : i32
    %c0_i32_1 = arith.constant 0 : i32
    return %c0_i32, %c0_i32_0 : i32, i32
  }
  func.func @transform_6(%arg0: i32) -> (i32, i32) {
    %c0_i32 = arith.constant 0 : i32
    %c0_i32_0 = arith.constant 0 : i32
    %c0_i32_1 = arith.constant 0 : i32
    return %c0_i32, %c0_i32_0 : i32, i32
  }
  func.func @transform_7(%arg0: i32) -> (i32, i32) {
    %c0_i32 = arith.constant 0 : i32
    %c0_i32_0 = arith.constant 0 : i32
    %c0_i32_1 = arith.constant 0 : i32
    return %c0_i32, %c0_i32_0 : i32, i32
  }
  func.func @transform_8(%arg0: i32) -> (i32, i32) {
    %c0_i32 = arith.constant 0 : i32
    %c0_i32_0 = arith.constant 0 : i32
    return %arg0, %c0_i32 : i32, i32
  }
}

</mosaic_0001>

<bundles_post_ra>
// kernel: low_level_network_forward.1
= control target key start
LH: loop header
LB: loop body
LE: loop exit
PB: predicated region body
PF: predicated region fallthrough
CT: control target
= control target key end

     0   :  { %vm82_vm0 = vcmask 1040384   ;;  %vm83_vm1 = vcmask 1041408   ;;  %v338_v2 = vmov 65535   ;;  %s444_s0 = inlined_call_operand.vmem [shape: f32[4,67], index: 0, kind: input, shape index: {}]   ;;  %s445_s1 = inlined_call_operand.vmem [shape: f32[1,67], index: 1, kind: input, shape index: {}]   ;;  %s446_s2 = inlined_call_operand.vmem [shape: bf16[67,64], index: 2, kind: input, shape index: {}]   ;;  %s447_s3 = inlined_call_operand.vmem [shape: f32[1,64], index: 3, kind: input, shape index: {}]   ;;  %s448_s4 = inlined_call_operand.vmem [shape: bf16[64,64], index: 4, kind: input, shape index: {}]   ;;  %s449_s5 = inlined_call_operand.vmem [shape: f32[1,64], index: 5, kind: input, shape index: {}]   ;;  %s450_s6 = inlined_call_operand.vmem [shape: bf16[64,12], index: 6, kind: input, shape index: {}]   ;;  %s451_s7 = inlined_call_operand.vmem [shape: f32[1,12], index: 7, kind: input, shape index: {}]   ;;  %s452_s8 = inlined_call_operand.hbm [shape: f32[4,12], index: 8, kind: output, shape index: {}]  }
   0x1   :  { %v46_v0 = vld [vmem:[%s446_s2 + $0x20] sm:$0x3]  ;;  %v84_v3 = vsel %vm82_vm0, 4294967295, %v338_v2 }
   0x2   :  { %v68_v1 = vunpack.c.l.b16 %v46_v0  ;;  %v85_v4 = vsel %vm83_vm1, %v84_v3, 0 }
   0x4   :  { %v73_v5 = vpack.c.b16 %v68_v1, %v68_v1 }
   0x5   :  { %13 = vsyncpa [#allocation3], 0  ;;  %v293_v7 = vld [vmem:[%s446_s2 + $0x18] sm:$0xff]  ;;  %v292_v8 = vld [vmem:[%s446_s2 + $0x10] sm:$0xff]  ;;  %vm78_vm2 = vcmask 547840   ;;  %vm144_vm4 = vcmask 523264  }
   0x6   :  { %v87_v6 = vand.u32 %v85_v4, %v73_v5  ;;  %v304_v9 = vld [vmem:[%s445_s1] ss:$0 sm:$0xff]  ;;  %v291_v10 = vld [vmem:[%s446_s2 + $0x8] sm:$0xff]  ;;  %v297_v15 = vld [vmem:[%s448_s4 + $0x18] sm:$0xff]  ;;  %s228_s16 = sshll.u32 %s452_s8, 4  ;;  %vm219_vm6 = vcmask 93184   ;;  %s229_s16 = int_to_ptr.hbm [resolvable:$true] %s228_s16 }
   0x7   :  { %v31_v11 = vld [vmem:[%s444_s0] sm:$0xf]  ;;  %152 = vmatpush.bf16.msra.mxu1 %v297_v15  ;;  %v296_v16 = vld [vmem:[%s448_s4 + $0x10] sm:$0xff]  ;;  %v295_v17 = vld [vmem:[%s448_s4 + $0x8] sm:$0xff] }
   0x8   :  { %92 = vmatpush.bf16.msra.mxu0 %v87_v6  ;;  %v36_v12 = vsub.f32 %v31_v11, %v304_v9  ;;  %v290_v13 = vld [vmem:[%s446_s2] sm:$0xff]  ;;  %v301_v28 = vld [vmem:[%s450_s6 + $0x18] sm:$0xff]  ;;  %v300_v29 = vld [vmem:[%s450_s6 + $0x10] sm:$0xff] }
   0x9   :  { %v294_v18 = vld [vmem:[%s448_s4] sm:$0xff]  ;;  %210 = vmatpush.bf16.msra.mxu2 %v301_v28  ;;  %v299_v30 = vld [vmem:[%s450_s6 + $0x8] sm:$0xff] }
   0xa   :  { %v37_v14 = vpack.c.bf16 %v36_v12, %v36_v12  ;;  %v305_v19 = vld [vmem:[%s447_s3] ss:$0 sm:$0xff] }
   0xb   :  { %153 = vmatpush.bf16.msra.mxu1 %v296_v16  ;;  %v298_v31 = vld [vmem:[%s450_s6] sm:$0xff]  ;;  %s339_s6 = smov [#allocation2]  }
   0xc   :  { %93 = vmatpush.bf16.msra.mxu0 %v293_v7  ;;  %v306_v32 = vld [vmem:[%s449_s5] ss:$0 sm:$0xff]  ;;  %s226_s14 = sshll.u32 %s339_s6, 4  ;;  %s227_s14 = int_to_ptr.vmem [resolvable:$true] %s226_s14 }
   0xd   :  { %211 = vmatpush.bf16.msra.mxu2 %v300_v29  ;;  %v307_v41 = vld [vmem:[%s451_s7] ss:$0 sm:$0xff] }
   0xf   :  { %154 = vmatpush.bf16.msra.mxu1 %v295_v17 }
  0x10   :  { %94 = vmatpush.bf16.msra.mxu0 %v292_v8 }
  0x11   :  { %212 = vmatpush.bf16.msra.mxu2 %v299_v30 }
  0x13   :  { %155 = vmatpush.bf16.msra.mxu1 %v294_v18 }
  0x14   :  { %95 = vmatpush.bf16.msra.mxu0 %v291_v10 }
  0x15   :  { %213 = vmatpush.bf16.msra.mxu2 %v298_v31 }
  0x18   :  { %96 = vmatpush.bf16.msra.mxu0 %v290_v13 }
  0x1b   :  { %253 = vmatmul.msk.bf16.vlgmr.msra.gmra.mxu0 %vm78_vm2, %v37_v14 }
  0x98   :  { %v98_v20 = vpop.f32.mrf.mxu0 }
  0x99   :  { %v99_v21 = vadd.f32 %v305_v19, %v98_v20 }
  0x9b   :  { %v103_v22 = vmul.f32 1.442695, %v99_v21  ;;  %vm102_vm3 = vcmp.gt.f32.partialorder %v99_v21, 0.0 }
  0x9d   :  { %308 = vpow2.f32 %v103_v22 }
  0xa0   :  { %v100_v23 = vpop.f32.mrf.mxu0 }
  0xa3   :  { %v309_v24 = vpop.eup %308 }
  0xa4   :  { %v254_v25 = vadd.f32 -1.0, %v309_v24 }
  0xa6   :  { %v106_v26 = vsel %vm102_vm3, %v99_v21, %v254_v25 }
  0xa7   :  { %v107_v27 = vpack.c.bf16 %v106_v26, %v106_v26 }
  0xa9   :  { %271 = vmatmul.msk.bf16.vlgmr.msra.gmra.mxu1 %vm144_vm4, %v107_v27 }
 0x126   :  { %v157_v33 = vpop.f32.mrf.mxu1 }
 0x127   :  { %v158_v34 = vadd.f32 %v306_v32, %v157_v33 }
 0x129   :  { %v162_v35 = vmul.f32 1.442695, %v158_v34  ;;  %vm161_vm5 = vcmp.gt.f32.partialorder %v158_v34, 0.0 }
 0x12b   :  { %310 = vpow2.f32 %v162_v35 }
 0x12e   :  { %v159_v36 = vpop.f32.mrf.mxu1 }
 0x131   :  { %v311_v37 = vpop.eup %310 }
 0x132   :  { %v272_v38 = vadd.f32 -1.0, %v311_v37 }
 0x134   :  { %v165_v39 = vsel %vm161_vm5, %v158_v34, %v272_v38 }
 0x135   :  { %v166_v40 = vpack.c.bf16 %v165_v39, %v165_v39 }
 0x137   :  { %289 = vmatmul.msk.bf16.vlgmr.msra.gmra.mxu2 %vm144_vm4, %v166_v40 }
 0x1ba   :  { %v215_v42 = vpop.f32.mrf.mxu2 }
 0x1bb   :  { %v216_v43 = vadd.f32 %v307_v41, %v215_v42 }
 0x1bd   :  { %220 = vst.msk [vmem:[#allocation2] sm:$0xf] %vm219_vm6, %v216_v43 }
 0x1be   :  { %231 = dma.vmem_to_hbm [thread:$0]  %s227_s14, 64, %s229_s16, [#allocation3]  }
 0x1c2   :  { %v217_v44 = vpop.f32.mrf.mxu2 }
 0x1c3   :  { %336 = dma.done.wait [#allocation3], 64  }
 0x1c4   :  { %337 = vsyncadd [#allocation3], 4294967232 }
 0x1c5   :  { %236 = vsyncpa [#allocation3], 1 }

</bundles_post_ra>
